<compile_context>
chip_gen: v7x
topology: tpu7x:2x2x1
jax: 0.10.0
libtpu: 0.0.40
codegen_flags: <defaults>
</compile_context>

<pallas_src>
import jax
import jax.numpy as jnp
from jax.experimental import pallas as pl
from jax.experimental.pallas import tpu as pltpu


# ----------------------------- helpers ---------------------------------------
def _round_up(x, m):
    return ((x + m - 1) // m) * m


def _choose_tile_b(B, D, itemsize, tile_b):
    """Largest batch tile such that 6 inputs x 2 buffers fit a conservative
    VMEM budget (safe on v5e/v6e/v7x), rounded to the sublane quantum (8)."""
    budget = 8 * 1024 * 1024  # bytes for the double-buffered input tiles
    max_rows = max(8, budget // (6 * 2 * D * itemsize))
    tb = int(min(tile_b, max_rows))
    if B <= tb:
        return _round_up(max(B, 1), 8)   # single-block grid
    return max(8, (tb // 8) * 8)


# ----------------------------- Pallas kernel --------------------------------
def complex_score_kernel(e_re_h_ref, e_im_h_ref, r_re_ref, r_im_ref,
                         e_re_t_ref, e_im_t_ref, out_ref):
    f32 = jnp.float32
    # Upcast to f32 for accumulation (inputs may arrive as bf16 to halve HBM
    # traffic; the kernel is mem-bound so the casts ride in VPU slack).
    e_re_h = e_re_h_ref[...].astype(f32)
    e_im_h = e_im_h_ref[...].astype(f32)
    r_re = r_re_ref[...].astype(f32)
    r_im = r_im_ref[...].astype(f32)
    e_re_t = e_re_t_ref[...].astype(f32)
    e_im_t = e_im_t_ref[...].astype(f32)

    # Factored ComplEx score (fewer VALU multiplies, fewer live temporaries):
    #   score = e_re_h*(r_re*e_re_t + r_im*e_im_t)
    #         + e_im_h*(r_re*e_im_t - r_im*e_re_t)
    t_re = r_re * e_re_t + r_im * e_im_t
    t_im = r_re * e_im_t - r_im * e_re_t
    p = e_re_h * t_re + e_im_h * t_im                 # (tile_b, D)

    # Reduce over the embedding (lane) dimension.
    out_ref[...] = jnp.sum(p, axis=1, keepdims=True)  # (tile_b, 1)


def complex_score_pallas(e_re_h, e_im_h, r_re, r_im, e_re_t, e_im_t,
                         *, tile_b=512):
    """All inputs: (B, D), identical dtype (float32 or bfloat16).
    Returns (B,) float32 ComplEx scores."""
    B, D = e_re_h.shape
    itemsize = jnp.dtype(e_re_h.dtype).itemsize
    tb = _choose_tile_b(B, D, itemsize, tile_b)
    B_pad = _round_up(B, tb)

    ins = (e_re_h, e_im_h, r_re, r_im, e_re_t, e_im_t)
    if B_pad != B:
        # Padded rows are zero -> contribute score 0; sliced off below.
        pad = B_pad - B
        ins = tuple(jnp.pad(x, ((0, pad), (0, 0))) for x in ins)

    emb_spec = pl.BlockSpec((tb, D), lambda i: (i, 0))
    out_spec = pl.BlockSpec((tb, 1), lambda i: (i, 0))

    out = pl.pallas_call(
        complex_score_kernel,
        out_shape=jax.ShapeDtypeStruct((B_pad, 1), jnp.float32),
        grid_spec=pltpu.PrefetchScalarGridSpec(
            num_scalar_prefetch=0,
            grid=(B_pad // tb,),
            in_specs=[emb_spec] * 6,
            out_specs=out_spec,
        ),
        compiler_params=pltpu.CompilerParams(
            dimension_semantics=("parallel",),
            vmem_limit_bytes=32 * 1024 * 1024,
        ),
    )(*ins)
    return out[:B, 0]


# ----------------------------- ComplEx model ---------------------------------
def xavier_uniform(key, shape, dtype=jnp.float32):
    # nn.init.xavier_uniform_ on an (fan_out, fan_in) weight matrix
    fan_out, fan_in = shape
    bound = (6.0 / (fan_in + fan_out)) ** 0.5
    return jax.random.uniform(key, shape, dtype, minval=-bound, maxval=bound)


def init_complex_params(key, num_ent, num_rel, emb_dim):
    k0, k1, k2, k3 = jax.random.split(key, 4)
    return {
        "ent_re": xavier_uniform(k0, (num_ent, emb_dim)),
        "ent_im": xavier_uniform(k1, (num_ent, emb_dim)),
        "rel_re": xavier_uniform(k2, (num_rel, emb_dim)),
        "rel_im": xavier_uniform(k3, (num_rel, emb_dim)),
    }


def complex_forward(params, hs, rs, ts, *, compute_dtype=jnp.bfloat16,
                    tile_b=512):
    """ComplEx forward pass.  The embedding lookups (gather) stay in XLA; the
    cast to `compute_dtype` fuses into the gather so the intermediate (B, D)
    arrays written to / re-read from HBM are half-width when bf16 is used.
    The scoring hot path (elementwise + reduce) runs in the Pallas kernel
    with float32 accumulation."""
    cd = compute_dtype
    e_re_h = jnp.take(params["ent_re"], hs, axis=0).astype(cd)
    e_im_h = jnp.take(params["ent_im"], hs, axis=0).astype(cd)
    e_re_t = jnp.take(params["ent_re"], ts, axis=0).astype(cd)
    e_im_t = jnp.take(params["ent_im"], ts, axis=0).astype(cd)
    r_re = jnp.take(params["rel_re"], rs, axis=0).astype(cd)
    r_im = jnp.take(params["rel_im"], rs, axis=0).astype(cd)
    return complex_score_pallas(e_re_h, e_im_h, r_re, r_im, e_re_t, e_im_t,
                                tile_b=tile_b)


complex_forward_jit = jax.jit(complex_forward,
                              static_argnames=("compute_dtype", "tile_b"))


def complex_forward_ref(params, hs, rs, ts, compute_dtype=jnp.float32):
    """Pure-JAX reference matching the PyTorch _calc formula (optionally with
    the same input-cast the kernel path uses, for apples-to-apples checks)."""
    cd = compute_dtype
    f32 = jnp.float32
    e_re_h = params["ent_re"][hs].astype(cd).astype(f32)
    e_im_h = params["ent_im"][hs].astype(cd).astype(f32)
    e_re_t = params["ent_re"][ts].astype(cd).astype(f32)
    e_im_t = params["ent_im"][ts].astype(cd).astype(f32)
    r_re = params["rel_re"][rs].astype(cd).astype(f32)
    r_im = params["rel_im"][rs].astype(cd).astype(f32)
    return jnp.sum(r_re * e_re_h * e_re_t + r_re * e_im_h * e_im_t
                   + r_im * e_re_h * e_im_t - r_im * e_im_h * e_re_t, axis=1)


if __name__ == "__main__":
    # --- small demo shapes consistent with the module -----------------------
    num_ent, num_rel, emb_dim = 16, 4, 32
    batch = 8

    key = jax.random.PRNGKey(0)
    kp, kh, kr, kt = jax.random.split(key, 4)
    params = init_complex_params(kp, num_ent, num_rel, emb_dim)
    hs = jax.random.randint(kh, (batch,), 0, num_ent, dtype=jnp.int32)
    rs = jax.random.randint(kr, (batch,), 0, num_rel, dtype=jnp.int32)
    ts = jax.random.randint(kt, (batch,), 0, num_ent, dtype=jnp.int32)

    # 1) exact-semantics float32 path (matches PyTorch forward numerics)
    out_f32 = jax.block_until_ready(
        complex_forward_jit(params, hs, rs, ts, compute_dtype=jnp.float32))
    ref_f32 = complex_forward_ref(params, hs, rs, ts)
    assert out_f32.shape == (batch,)
    assert jnp.allclose(out_f32, ref_f32, atol=1e-5, rtol=1e-5)

    # 2) default bf16-transfer / f32-accumulate path
    out_bf = jax.block_until_ready(complex_forward_jit(params, hs, rs, ts))
    ref_bf = complex_forward_ref(params, hs, rs, ts, compute_dtype=jnp.bfloat16)
    assert out_bf.shape == (batch,)
    assert jnp.allclose(out_bf, ref_bf, atol=1e-3, rtol=1e-3)

    # 3) ragged batch + multi-step grid (exercises padding & pipelining)
    B2, D2, NE2, NR2 = 300, 96, 64, 11
    kp2, kh2, kr2, kt2 = jax.random.split(jax.random.PRNGKey(1), 4)
    params2 = init_complex_params(kp2, NE2, NR2, D2)
    hs2 = jax.random.randint(kh2, (B2,), 0, NE2, dtype=jnp.int32)
    rs2 = jax.random.randint(kr2, (B2,), 0, NR2, dtype=jnp.int32)
    ts2 = jax.random.randint(kt2, (B2,), 0, NE2, dtype=jnp.int32)
    out2 = jax.block_until_ready(
        complex_forward_jit(params2, hs2, rs2, ts2,
                            compute_dtype=jnp.float32, tile_b=128))
    ref2 = complex_forward_ref(params2, hs2, rs2, ts2)
    assert out2.shape == (B2,)
    assert jnp.allclose(out2, ref2, atol=1e-4, rtol=1e-4)

    print("KERNEL_OK")
</pallas_src>

<mosaic_0001>
module attributes {stable_mosaic.version = 11 : i64} {
  func.func @complex_score_kernel(%arg0: i32, %arg1: memref<8x32xf32, #tpu.memory_space<vmem>>, %arg2: memref<8x32xf32, #tpu.memory_space<vmem>>, %arg3: memref<8x32xf32, #tpu.memory_space<vmem>>, %arg4: memref<8x32xf32, #tpu.memory_space<vmem>>, %arg5: memref<8x32xf32, #tpu.memory_space<vmem>>, %arg6: memref<8x32xf32, #tpu.memory_space<vmem>>, %arg7: memref<8x1xf32, #tpu.memory_space<vmem>>) attributes {dimension_semantics = [#tpu.dimension_semantics<parallel>], iteration_bounds = array<i64: 1>, scalar_prefetch = 0 : i64, scratch_operands = 0 : i64, tpu.core_type = #tpu.core_type<tc>, window_params = [{transform_indices = @transform_0, window_bounds = array<i64: 8, 32>}, {transform_indices = @transform_1, window_bounds = array<i64: 8, 32>}, {transform_indices = @transform_2, window_bounds = array<i64: 8, 32>}, {transform_indices = @transform_3, window_bounds = array<i64: 8, 32>}, {transform_indices = @transform_4, window_bounds = array<i64: 8, 32>}, {transform_indices = @transform_5, window_bounds = array<i64: 8, 32>}, {transform_indices = @transform_6, window_bounds = array<i64: 8, 1>}]} {
    %c0 = arith.constant 0 : index
    %c0_0 = arith.constant 0 : index
    %0 = vector.load %arg1[%c0, %c0_0] : memref<8x32xf32, #tpu.memory_space<vmem>>, vector<8x32xf32>
    %c0_1 = arith.constant 0 : index
    %c0_2 = arith.constant 0 : index
    %1 = vector.load %arg2[%c0_1, %c0_2] : memref<8x32xf32, #tpu.memory_space<vmem>>, vector<8x32xf32>
    %c0_3 = arith.constant 0 : index
    %c0_4 = arith.constant 0 : index
    %2 = vector.load %arg3[%c0_3, %c0_4] : memref<8x32xf32, #tpu.memory_space<vmem>>, vector<8x32xf32>
    %c0_5 = arith.constant 0 : index
    %c0_6 = arith.constant 0 : index
    %3 = vector.load %arg4[%c0_5, %c0_6] : memref<8x32xf32, #tpu.memory_space<vmem>>, vector<8x32xf32>
    %c0_7 = arith.constant 0 : index
    %c0_8 = arith.constant 0 : index
    %4 = vector.load %arg5[%c0_7, %c0_8] : memref<8x32xf32, #tpu.memory_space<vmem>>, vector<8x32xf32>
    %c0_9 = arith.constant 0 : index
    %c0_10 = arith.constant 0 : index
    %5 = vector.load %arg6[%c0_9, %c0_10] : memref<8x32xf32, #tpu.memory_space<vmem>>, vector<8x32xf32>
    %6 = arith.mulf %2, %4 : vector<8x32xf32>
    %7 = arith.mulf %3, %5 : vector<8x32xf32>
    %8 = arith.addf %6, %7 : vector<8x32xf32>
    %9 = arith.mulf %2, %5 : vector<8x32xf32>
    %10 = arith.mulf %3, %4 : vector<8x32xf32>
    %11 = arith.subf %9, %10 : vector<8x32xf32>
    %12 = arith.mulf %0, %8 : vector<8x32xf32>
    %13 = arith.mulf %1, %11 : vector<8x32xf32>
    %14 = arith.addf %12, %13 : vector<8x32xf32>
    %cst = arith.constant dense<0.000000e+00> : vector<8xf32>
    %15 = vector.multi_reduction <add>, %14, %cst [1] : vector<8x32xf32> to vector<8xf32>
    %16 = vector.shape_cast %15 : vector<8xf32> to vector<8x1xf32>
    %c0_11 = arith.constant 0 : index
    %c0_12 = arith.constant 0 : index
    %17 = vector.load %arg7[%c0_11, %c0_12] : memref<8x1xf32, #tpu.memory_space<vmem>>, vector<8x1xf32>
    tpu.vector_store %arg7[%c0_11, %c0_12], %16 {strides = array<i32>} : memref<8x1xf32, #tpu.memory_space<vmem>>, vector<8x1xf32>,
    return
  }
  func.func @transform_0(%arg0: i32) -> (i32, i32) {
    %c0_i32 = arith.constant 0 : i32
    %c0_i32_0 = arith.constant 0 : i32
    return %arg0, %c0_i32 : i32, i32
  }
  func.func @transform_1(%arg0: i32) -> (i32, i32) {
    %c0_i32 = arith.constant 0 : i32
    %c0_i32_0 = arith.constant 0 : i32
    return %arg0, %c0_i32 : i32, i32
  }
  func.func @transform_2(%arg0: i32) -> (i32, i32) {
    %c0_i32 = arith.constant 0 : i32
    %c0_i32_0 = arith.constant 0 : i32
    return %arg0, %c0_i32 : i32, i32
  }
  func.func @transform_3(%arg0: i32) -> (i32, i32) {
    %c0_i32 = arith.constant 0 : i32
    %c0_i32_0 = arith.constant 0 : i32
    return %arg0, %c0_i32 : i32, i32
  }
  func.func @transform_4(%arg0: i32) -> (i32, i32) {
    %c0_i32 = arith.constant 0 : i32
    %c0_i32_0 = arith.constant 0 : i32
    return %arg0, %c0_i32 : i32, i32
  }
  func.func @transform_5(%arg0: i32) -> (i32, i32) {
    %c0_i32 = arith.constant 0 : i32
    %c0_i32_0 = arith.constant 0 : i32
    return %arg0, %c0_i32 : i32, i32
  }
  func.func @transform_6(%arg0: i32) -> (i32, i32) {
    %c0_i32 = arith.constant 0 : i32
    %c0_i32_0 = arith.constant 0 : i32
    return %arg0, %c0_i32 : i32, i32
  }
}

</mosaic_0001>

<bundles_post_ra>
// kernel: complex_forward.1
= control target key start
LH: loop header
LB: loop body
LE: loop exit
PB: predicated region body
PF: predicated region fallthrough
CT: control target
= control target key end

     0   :  { %vm38_vm0 = vcmask 261120   ;;  %vm42_vm1 = vcmask 7168   ;;  %s104_s2 = inlined_call_operand.vmem [shape: f32[8,32], index: 2, kind: input, shape index: {}]   ;;  %s105_s3 = inlined_call_operand.vmem [shape: f32[8,32], index: 3, kind: input, shape index: {}]   ;;  %s106_s4 = inlined_call_operand.vmem [shape: f32[8,32], index: 4, kind: input, shape index: {}]   ;;  %s107_s5 = inlined_call_operand.vmem [shape: f32[8,32], index: 5, kind: input, shape index: {}]   ;;  %s108_s0 = inlined_call_operand.vmem [shape: f32[8,32], index: 0, kind: input, shape index: {}]   ;;  %s109_s1 = inlined_call_operand.vmem [shape: f32[8,32], index: 1, kind: input, shape index: {}]   ;;  %s110_s6 = inlined_call_operand.vmem [shape: f32[8,1], index: 6, kind: output, shape index: {}]  }
   0x1   :  { %v25_v0 = vld [vmem:[%s104_s2] sm:$0xff] }
   0x2   :  { %v26_v1 = vld [vmem:[%s105_s3] sm:$0xff] }
   0x3   :  { %v27_v2 = vld [vmem:[%s106_s4] sm:$0xff] }
   0x4   :  { %v28_v3 = vld [vmem:[%s107_s5] sm:$0xff]  ;;  %v29_v4 = vmul.f32 %v27_v2, %v25_v0  ;;  %v33_v7 = vmul.f32 %v27_v2, %v26_v1 }
   0x5   :  { %v30_v5 = vmul.f32 %v28_v3, %v26_v1  ;;  %v32_v6 = vmul.f32 %v28_v3, %v25_v0  ;;  %v23_v8 = vld [vmem:[%s108_s0] sm:$0xff] }
   0x6   :  { %v24_v9 = vld [vmem:[%s109_s1] sm:$0xff] }
   0x7   :  { %v31_v10 = vadd.f32 %v30_v5, %v29_v4  ;;  %v34_v11 = vsub.f32 %v32_v6, %v33_v7 }
   0x9   :  { %v35_v12 = vmul.f32 %v31_v10, %v23_v8  ;;  %v36_v13 = vmul.f32 %v34_v11, %v24_v9 }
   0xb   :  { %v37_v14 = vadd.f32 %v36_v13, %v35_v12 }
   0xd   :  { %v39_v15 = vsel %vm38_vm0, %v37_v14, 0.0 }
   0xe   :  { %40 = vadd.xlane.f32.xlu0 %v39_v15 }
  0x9b   :  { %v41_v16 = vpop.xlane.xlu0 %40 }
  0x9c   :  { %43 = vst.msk [vmem:[%s110_s6] sm:$0xff] %vm42_vm1, %v41_v16 }

</bundles_post_ra>
